<compile_context>
chip_gen: v5e
topology: v5e:2x2
jax: 0.10.0
libtpu: 0.0.40
codegen_flags: <defaults>
</compile_context>

<pallas_src>
import functools

import jax
import jax.numpy as jnp
from jax import lax
from jax.experimental import pallas as pl
from jax.experimental.pallas import tpu as pltpu

_LANES = 128
_CHUNK_ROWS = 8          # one (8, 128) vreg slab per inner-loop chunk
_HOLD_CLASS_LIMIT = 32   # hold all per-class slabs in vregs when C is small


def _focal_loss_kernel(logits_ref, target_ref, out_ref, acc_ref, *,
                       num_classes: int, gamma: float, n_pix: int,
                       rows_per_tile: int):
    """One (batch, spatial-tile) grid step.

    logits_ref: (1, C, TR, 128)   class logits for this tile
    target_ref: (1, TR, 128)      int32 class index per pixel
    out_ref:    (1, 8, 128)       per-batch partial sums (stored on last tile)
    acc_ref:    (8, 128) f32      VMEM accumulator, resident across tile axis
    """
    n = pl.program_id(1)

    @pl.when(n == 0)
    def _():
        acc_ref[...] = jnp.zeros_like(acc_ref)

    n_chunks = rows_per_tile // _CHUNK_ROWS
    hold = num_classes <= _HOLD_CLASS_LIMIT

    # Hoisted iota (computed once, reused every chunk): pixel offset of each
    # (row, lane) position within a chunk.
    pix_in_chunk = (
        lax.broadcasted_iota(jnp.int32, (_CHUNK_ROWS, _LANES), 0) * _LANES
        + lax.broadcasted_iota(jnp.int32, (_CHUNK_ROWS, _LANES), 1))

    tile_pix0 = (n * rows_per_tile) * _LANES   # first pixel index of this tile
    gi = float(gamma)

    def chunk_body(ci, carry):
        r0 = pl.multiple_of(ci * _CHUNK_ROWS, _CHUNK_ROWS)
        tgt = target_ref[0, pl.ds(r0, _CHUNK_ROWS), :]          # (8,128) i32

        def load(c):
            return logits_ref[0, c, pl.ds(r0, _CHUNK_ROWS), :].astype(jnp.float32)

        if hold:
            xs = [load(c) for c in range(num_classes)]
            get = lambda c: xs[c]
        else:
            get = load

        # Max over classes: class axis lives across vregs -> pure VPU, no XLU.
        m = get(0)
        for c in range(1, num_classes):
            m = jnp.maximum(m, get(c))

        # Softmax denominator + "gather" of the target class via selects.
        s = jnp.zeros_like(m)        # sum_c exp(x_c - m)
        sel = jnp.zeros_like(m)      # x_t - m
        for c in range(num_classes):
            e = get(c) - m
            s = s + jnp.exp(e)
            sel = jnp.where(tgt == c, e, sel)

        logpt = sel - jnp.log(s)                                 # log p_t
        pt = jnp.exp(logpt)                                      # p_t (one EUP op)

        one_m_pt = 1.0 - pt
        if gi == 0.0:
            w = jnp.ones_like(pt)
        elif gi.is_integer() and gi > 0:
            w = one_m_pt
            for _ in range(int(gi) - 1):                         # gamma=2 -> 1 vmul
                w = w * one_m_pt
        else:
            w = jnp.power(jnp.maximum(one_m_pt, 0.0), gi)

        loss = -w * logpt

        # Validity derived purely from indices: masks both the (<1024 px)
        # spatial padding and any ragged final tile (whose OOB reads are
        # unspecified — select, not multiply, so garbage/NaN cannot leak in).
        remaining = n_pix - (tile_pix0 + r0 * _LANES)
        valid = pix_in_chunk < remaining
        acc_ref[...] += jnp.where(valid, loss, 0.0)
        return carry

    lax.fori_loop(0, n_chunks, chunk_body, 0,
                  unroll=(n_chunks if n_chunks <= 8 else 8))

    @pl.when(n == pl.num_programs(1) - 1)
    def _():
        out_ref[0] = acc_ref[...]      # lane-dense (8,128) store, no reduce here


def segmentation_focal_loss(logits, target, *, gamma=2.0, max_block_rows=1024):
    """logits: (B, C, H, W) float, target: (B, H, W) int class index."""
    B, C, H, W = logits.shape
    assert target.shape == (B, H, W)
    n_pix = H * W

    logits_f = logits.reshape(B, C, n_pix)
    target_f = target.reshape(B, n_pix).astype(jnp.int32)

    # Lane-dense layout: (rows, 128) with rows a multiple of 8.  Pad only up to
    # the next 8*128-pixel boundary; common aligned sizes need no pad at all.
    nr8 = -(-n_pix // (8 * _LANES)) * 8
    n_pad = nr8 * _LANES
    if n_pad != n_pix:
        logits_f = jnp.pad(logits_f, ((0, 0), (0, 0), (0, n_pad - n_pix)))
        target_f = jnp.pad(target_f, ((0, 0), (0, n_pad - n_pix)))

    logits_r = logits_f.reshape(B, C, nr8, _LANES)
    target_r = target_f.reshape(B, nr8, _LANES)

    # VMEM-budget-driven tile size: double-buffered logits + target per row of
    # 128 pixels, scaled to this generation's VMEM (v5e/v6e 128 MiB, v7x 64 MiB).
    try:
        vmem_cap = int(pltpu.get_tpu_info().vmem_capacity_bytes)
    except Exception:  # conservative fallback if the query is unavailable
        vmem_cap = 64 * 1024 * 1024
    budget = min(int(vmem_cap * 0.55), 72 * 1024 * 1024)
    itemsize = jnp.dtype(logits_r.dtype).itemsize
    per_row_bytes = 2 * (C * itemsize + 4) * _LANES
    tr = budget // per_row_bytes
    tr = max(8, (min(tr, max_block_rows, nr8) // 8) * 8)
    n_tiles = pl.cdiv(nr8, tr)

    vmem_limit = max(32 * 1024 * 1024,
                     min(int(vmem_cap * 0.9), 100 * 1024 * 1024))

    kernel = functools.partial(_focal_loss_kernel, num_classes=C,
                               gamma=float(gamma), n_pix=n_pix,
                               rows_per_tile=tr)

    bytes_acc = (logits_r.size * itemsize + target_r.size * 4
                 + B * 8 * _LANES * 4)
    cost = pl.CostEstimate(
        flops=int(B * n_pad * (6 * C + 16)),
        transcendentals=int(B * n_pad * (C + 2)),
        bytes_accessed=int(bytes_acc),
    )

    partials = pl.pallas_call(
        kernel,
        out_shape=jax.ShapeDtypeStruct((B, 8, _LANES), jnp.float32),
        grid_spec=pltpu.PrefetchScalarGridSpec(
            num_scalar_prefetch=0,
            grid=(B, n_tiles),
            in_specs=[
                pl.BlockSpec((1, C, tr, _LANES), lambda b, n: (b, 0, n, 0)),
                pl.BlockSpec((1, tr, _LANES), lambda b, n: (b, n, 0)),
            ],
            out_specs=pl.BlockSpec((1, 8, _LANES), lambda b, n: (b, 0, 0)),
            scratch_shapes=[pltpu.VMEM((8, _LANES), jnp.float32)],
        ),
        compiler_params=pltpu.CompilerParams(
            dimension_semantics=("parallel", "arbitrary"),
            vmem_limit_bytes=vmem_limit,
        ),
        cost_estimate=cost,
    )(logits_r, target_r)

    # Mean over all pixels; divisor is static (no count accumulator needed).
    return jnp.sum(partials) / jnp.float32(B * n_pix)


def segmentation_focal_loss_ref(logits, target, gamma=2.0):
    """Pure-JAX reference mirroring the PyTorch FocalLoss (alpha=None)."""
    B, C, H, W = logits.shape
    x = logits.reshape(B, C, H * W).transpose(0, 2, 1).reshape(-1, C)
    t = target.reshape(-1).astype(jnp.int32)
    logp = jax.nn.log_softmax(x, axis=-1)
    logpt = jnp.take_along_axis(logp, t[:, None], axis=1)[:, 0]
    pt = jnp.exp(logpt)
    loss = -((1.0 - pt) ** gamma) * logpt
    return jnp.mean(loss)


if __name__ == "__main__":
    B, C, H, W = 2, 4, 16, 16

    key = jax.random.PRNGKey(0)
    k1, k2 = jax.random.split(key)
    logits = jax.random.normal(k1, (B, C, H, W), dtype=jnp.float32)
    target = jax.random.randint(k2, (B, H, W), 0, C, dtype=jnp.int32)

    loss = jax.block_until_ready(segmentation_focal_loss(logits, target))
    ref = jax.block_until_ready(segmentation_focal_loss_ref(logits, target))

    assert jnp.allclose(loss, ref, rtol=1e-5, atol=1e-6), (loss, ref)
    print("KERNEL_OK")
</pallas_src>

<mosaic_0001>
module attributes {stable_mosaic.version = 11 : i64} {
  func.func @_focal_loss_kernel(%arg0: i32, %arg1: i32, %arg2: memref<1x4x8x128xf32, #tpu.memory_space<vmem>>, %arg3: memref<1x8x128xi32, #tpu.memory_space<vmem>>, %arg4: memref<1x8x128xf32, #tpu.memory_space<vmem>>, %arg5: memref<8x128xf32, #tpu.memory_space<vmem>>) attributes {dimension_semantics = [#tpu.dimension_semantics<parallel>, #tpu.dimension_semantics<arbitrary>], iteration_bounds = array<i64: 2, 1>, scalar_prefetch = 0 : i64, scratch_operands = 1 : i64, tpu.core_type = #tpu.core_type<tc>, window_params = [{transform_indices = @transform_0, window_bounds = array<i64: 1, 4, 8, 128>}, {transform_indices = @transform_1, window_bounds = array<i64: 1, 8, 128>}, {transform_indices = @transform_2, window_bounds = array<i64: 1, 8, 128>}]} {
    %c0_i32 = arith.constant 0 : i32
    %0 = arith.cmpi eq, %arg1, %c0_i32 : i32
    %1 = arith.extui %0 : i1 to i32
    %c0_i32_0 = arith.constant 0 : i32
    %2 = arith.cmpi ne, %1, %c0_i32_0 : i32
    scf.if %2 {
      %cst_27 = arith.constant 0.000000e+00 : f32
      %78 = vector.broadcast %cst_27 : f32 to vector<8x128xf32>
      %c0_28 = arith.constant 0 : index
      %c0_29 = arith.constant 0 : index
      %79 = vector.load %arg5[%c0_28, %c0_29] : memref<8x128xf32, #tpu.memory_space<vmem>>, vector<8x128xf32>
      tpu.vector_store %arg5[%c0_28, %c0_29], %78 {strides = array<i32>} : memref<8x128xf32, #tpu.memory_space<vmem>>, vector<8x128xf32>,
    } else {
    }
    %3 = tpu.iota {dimensions = array<i32: 0>} : vector<8x128xi32>
    %c128_i32 = arith.constant 128 : i32
    %4 = vector.broadcast %c128_i32 : i32 to vector<8x128xi32>
    %5 = arith.muli %3, %4 : vector<8x128xi32>
    %6 = tpu.iota {dimensions = array<i32: 1>} : vector<8x128xi32>
    %7 = arith.addi %5, %6 : vector<8x128xi32>
    %c8_i32 = arith.constant 8 : i32
    %8 = arith.muli %arg1, %c8_i32 : i32
    %c128_i32_1 = arith.constant 128 : i32
    %9 = arith.muli %8, %c128_i32_1 : i32
    %c0_i32_2 = arith.constant 0 : i32
    %c8_i32_3 = arith.constant 8 : i32
    %10 = arith.muli %c0_i32_2, %c8_i32_3 : i32
    %11 = tpu.assume_multiple %10, 8 : i32
    %c0 = arith.constant 0 : index
    %12 = arith.index_cast %11 : i32 to index
    %c0_4 = arith.constant 0 : index
    %13 = vector.load %arg3[%c0, %12, %c0_4] : memref<1x8x128xi32, #tpu.memory_space<vmem>>, vector<1x8x128xi32>
    %14 = vector.shape_cast %13 : vector<1x8x128xi32> to vector<8x128xi32>
    %c0_5 = arith.constant 0 : index
    %c0_6 = arith.constant 0 : index
    %15 = arith.index_cast %11 : i32 to index
    %c0_7 = arith.constant 0 : index
    %16 = vector.load %arg2[%c0_5, %c0_6, %15, %c0_7] : memref<1x4x8x128xf32, #tpu.memory_space<vmem>>, vector<1x1x8x128xf32>
    %17 = vector.shape_cast %16 : vector<1x1x8x128xf32> to vector<8x128xf32>
    %c0_8 = arith.constant 0 : index
    %c1 = arith.constant 1 : index
    %18 = arith.index_cast %11 : i32 to index
    %c0_9 = arith.constant 0 : index
    %19 = vector.load %arg2[%c0_8, %c1, %18, %c0_9] : memref<1x4x8x128xf32, #tpu.memory_space<vmem>>, vector<1x1x8x128xf32>
    %20 = vector.shape_cast %19 : vector<1x1x8x128xf32> to vector<8x128xf32>
    %c0_10 = arith.constant 0 : index
    %c2 = arith.constant 2 : index
    %21 = arith.index_cast %11 : i32 to index
    %c0_11 = arith.constant 0 : index
    %22 = vector.load %arg2[%c0_10, %c2, %21, %c0_11] : memref<1x4x8x128xf32, #tpu.memory_space<vmem>>, vector<1x1x8x128xf32>
    %23 = vector.shape_cast %22 : vector<1x1x8x128xf32> to vector<8x128xf32>
    %c0_12 = arith.constant 0 : index
    %c3 = arith.constant 3 : index
    %24 = arith.index_cast %11 : i32 to index
    %c0_13 = arith.constant 0 : index
    %25 = vector.load %arg2[%c0_12, %c3, %24, %c0_13] : memref<1x4x8x128xf32, #tpu.memory_space<vmem>>, vector<1x1x8x128xf32>
    %26 = vector.shape_cast %25 : vector<1x1x8x128xf32> to vector<8x128xf32>
    %27 = arith.maximumf %17, %20 : vector<8x128xf32>
    %28 = arith.maximumf %27, %23 : vector<8x128xf32>
    %29 = arith.maximumf %28, %26 : vector<8x128xf32>
    %cst = arith.constant 0.000000e+00 : f32
    %30 = vector.broadcast %cst : f32 to vector<8x128xf32>
    %cst_14 = arith.constant 0.000000e+00 : f32
    %31 = vector.broadcast %cst_14 : f32 to vector<8x128xf32>
    %32 = arith.subf %17, %29 : vector<8x128xf32>
    %33 = math.exp %32 : vector<8x128xf32>
    %34 = arith.addf %30, %33 : vector<8x128xf32>
    %c0_i32_15 = arith.constant 0 : i32
    %35 = vector.broadcast %c0_i32_15 : i32 to vector<8x128xi32>
    %36 = arith.cmpi eq, %14, %35 : vector<8x128xi32>
    %37 = arith.select %36, %32, %31 : vector<8x128xi1>, vector<8x128xf32>
    %38 = arith.subf %20, %29 : vector<8x128xf32>
    %39 = math.exp %38 : vector<8x128xf32>
    %40 = arith.addf %34, %39 : vector<8x128xf32>
    %c1_i32 = arith.constant 1 : i32
    %41 = vector.broadcast %c1_i32 : i32 to vector<8x128xi32>
    %42 = arith.cmpi eq, %14, %41 : vector<8x128xi32>
    %43 = arith.select %42, %38, %37 : vector<8x128xi1>, vector<8x128xf32>
    %44 = arith.subf %23, %29 : vector<8x128xf32>
    %45 = math.exp %44 : vector<8x128xf32>
    %46 = arith.addf %40, %45 : vector<8x128xf32>
    %c2_i32 = arith.constant 2 : i32
    %47 = vector.broadcast %c2_i32 : i32 to vector<8x128xi32>
    %48 = arith.cmpi eq, %14, %47 : vector<8x128xi32>
    %49 = arith.select %48, %44, %43 : vector<8x128xi1>, vector<8x128xf32>
    %50 = arith.subf %26, %29 : vector<8x128xf32>
    %51 = math.exp %50 : vector<8x128xf32>
    %52 = arith.addf %46, %51 : vector<8x128xf32>
    %c3_i32 = arith.constant 3 : i32
    %53 = vector.broadcast %c3_i32 : i32 to vector<8x128xi32>
    %54 = arith.cmpi eq, %14, %53 : vector<8x128xi32>
    %55 = arith.select %54, %50, %49 : vector<8x128xi1>, vector<8x128xf32>
    %56 = math.log %52 : vector<8x128xf32>
    %57 = arith.subf %55, %56 : vector<8x128xf32>
    %58 = math.exp %57 : vector<8x128xf32>
    %cst_16 = arith.constant 1.000000e+00 : f32
    %59 = vector.broadcast %cst_16 : f32 to vector<8x128xf32>
    %60 = arith.subf %59, %58 : vector<8x128xf32>
    %61 = arith.mulf %60, %60 : vector<8x128xf32>
    %cst_17 = arith.constant 0.000000e+00 : f32
    %62 = vector.broadcast %cst_17 : f32 to vector<8x128xf32>
    %63 = arith.subf %62, %61 : vector<8x128xf32>
    %64 = arith.mulf %63, %57 : vector<8x128xf32>
    %c128_i32_18 = arith.constant 128 : i32
    %65 = arith.muli %11, %c128_i32_18 : i32
    %66 = arith.addi %9, %65 : i32
    %c256_i32 = arith.constant 256 : i32
    %67 = arith.subi %c256_i32, %66 : i32
    %68 = vector.broadcast %67 : i32 to vector<8x128xi32>
    %69 = arith.cmpi slt, %7, %68 : vector<8x128xi32>
    %c0_19 = arith.constant 0 : index
    %c0_20 = arith.constant 0 : index
    %70 = vector.load %arg5[%c0_19, %c0_20] : memref<8x128xf32, #tpu.memory_space<vmem>>, vector<8x128xf32>
    %cst_21 = arith.constant 0.000000e+00 : f32
    %71 = vector.broadcast %cst_21 : f32 to vector<8x128xf32>
    %72 = arith.select %69, %64, %71 : vector<8x128xi1>, vector<8x128xf32>
    %73 = arith.addf %70, %72 : vector<8x128xf32>
    %c0_22 = arith.constant 0 : index
    %c0_23 = arith.constant 0 : index
    %74 = vector.load %arg5[%c0_22, %c0_23] : memref<8x128xf32, #tpu.memory_space<vmem>>, vector<8x128xf32>
    tpu.vector_store %arg5[%c0_22, %c0_23], %73 {strides = array<i32>} : memref<8x128xf32, #tpu.memory_space<vmem>>, vector<8x128xf32>,
    %c1_i32_24 = arith.constant 1 : i32
    %c0_i32_25 = arith.constant 0 : i32
    %75 = arith.cmpi eq, %arg1, %c0_i32_25 : i32
    %76 = arith.extui %75 : i1 to i32
    %c0_i32_26 = arith.constant 0 : i32
    %77 = arith.cmpi ne, %76, %c0_i32_26 : i32
    scf.if %77 {
      %c0_27 = arith.constant 0 : index
      %c0_28 = arith.constant 0 : index
      %78 = vector.load %arg5[%c0_27, %c0_28] : memref<8x128xf32, #tpu.memory_space<vmem>>, vector<8x128xf32>
      %c0_29 = arith.constant 0 : index
      %c0_30 = arith.constant 0 : index
      %c0_31 = arith.constant 0 : index
      %79 = vector.load %arg4[%c0_29, %c0_30, %c0_31] : memref<1x8x128xf32, #tpu.memory_space<vmem>>, vector<1x8x128xf32>
      %80 = vector.shape_cast %79 : vector<1x8x128xf32> to vector<8x128xf32>
      %81 = vector.shape_cast %78 : vector<8x128xf32> to vector<1x8x128xf32>
      tpu.vector_store %arg4[%c0_29, %c0_30, %c0_31], %81 {strides = array<i32>} : memref<1x8x128xf32, #tpu.memory_space<vmem>>, vector<1x8x128xf32>,
    } else {
    }
    return
  }
  func.func @transform_0(%arg0: i32, %arg1: i32) -> (i32, i32, i32, i32) {
    %c0_i32 = arith.constant 0 : i32
    %c0_i32_0 = arith.constant 0 : i32
    %c0_i32_1 = arith.constant 0 : i32
    return %arg0, %c0_i32, %arg1, %c0_i32_0 : i32, i32, i32, i32
  }
  func.func @transform_1(%arg0: i32, %arg1: i32) -> (i32, i32, i32) {
    %c0_i32 = arith.constant 0 : i32
    %c0_i32_0 = arith.constant 0 : i32
    return %arg0, %arg1, %c0_i32 : i32, i32, i32
  }
  func.func @transform_2(%arg0: i32, %arg1: i32) -> (i32, i32, i32) {
    %c0_i32 = arith.constant 0 : i32
    %c0_i32_0 = arith.constant 0 : i32
    %c0_i32_1 = arith.constant 0 : i32
    return %arg0, %c0_i32, %c0_i32_0 : i32, i32, i32
  }
}

</mosaic_0001>

<bundles_post_ra>
// kernel: tpu_custom_call.1
= control target key start
LH: loop header
LB: loop body
LE: loop exit
PB: predicated region body
PF: predicated region fallthrough
CT: control target
= control target key end

     0   :  { %7 = vsyncpa [#allocation4], 0  ;;  %s826_s0 = inlined_call_operand.hbm [shape: f32[2,4,8,128], index: 0, kind: input, shape index: {}]   ;;  %s827_s1 = inlined_call_operand.hbm [shape: s32[2,8,128], index: 1, kind: input, shape index: {}]   ;;  %s828_s2 = inlined_call_operand.hbm [shape: f32[2,8,128], index: 2, kind: output, shape index: {}]  }
   0x1   :  { %9 = vsyncpa [#allocation4 + $0x1], 0 }
   0x2   :  { %10 = vsyncpa [#allocation7], 0 }
   0x3   :  { %12 = vsyncpa [#allocation7 + $0x1], 0 }
   0x4   :  { %13 = vsyncpa [#allocation5], 0 }
   0x5   :  { %15 = vsyncpa [#allocation5 + $0x1], 0  ;;  %s684_s9 = smov 0   ;;  %s686_s10 = smov 0  }
   0x6   :  { %s688_s11 = smov 0   ;;  %s690_s12 = smov 0  }
   0x7   :  { %s692_s13 = smov 0   ;;  %s694_s14 = smov 0  }
   0x8 LB: > { %s417_s15 = sadd.s32 4294967295, %s665_s14   ;;  %s418_s16 = sadd.s32 4294967294, %s665_s14   ;;  %s665_s14 = sphi %s694_s14, %s21_s14   ;;  %s661_s13 = sphi %s692_s13, %s838_s13   ;;  %s657_s12 = sphi %s690_s12, %s837_s12   ;;  %s653_s11 = sphi %s688_s11, %s836_s11   ;;  %s649_s10 = sphi %s686_s10, %s835_s10   ;;  %s645_s9 = sphi %s684_s9, %s834_s9  }
   0x9   : > { %s33_s17 = sadd.s32 1, %s661_s13  ;;  %s42_s18 = sadd.s32 1, %s653_s11 }
   0xa   : > { %p35_p0 = scmp.ge.s32.totalorder %s33_s17, 2  ;;  %p49_p1 = scmp.ne.s32.totalorder %s653_s11, %s649_s10 }
   0xb   : > { %p50_p2 = scmp.eq.s32.totalorder %s665_s14, 0  ;;  %p55_p3 = scmp.ne.s32.totalorder %s649_s10, %s645_s9 }
   0xc   : > { %s840_s17 = smov (%p35_p0, %s33_s17), 0  ;;  %p56_p5 = scmp.eq.s32.totalorder %s417_s15, 0 }
   0xd   : > { %p725_p4 = por %p50_p2, %p49_p1  ;;  %s37_s20 = ssub.s32 %s661_s13, %s840_s17 }
   0xe   : > { %p107_p6 = scmp.eq.s32.totalorder %s417_s15, 1  ;;  %p40_p7 = scmp.eq.s32.totalorder %s37_s20, 0 }
   0xf   : > { %p731_p8 = por %p56_p5, %p55_p3  ;;  %p113_p10 = scmp.eq.s32.totalorder %s418_s16, 1 }
  0x10   : > { %p735_p9 = por %p107_p6, %p49_p1  ;;  %p420_p12 = scmp.ge.s32.totalorder %s665_s14, 2 }
  0x11   : > { %s740_s23 = scalar_select %p40_p7, %s653_s11, %s42_s18  }
  0x12   : > { %p742_p11 = por %p113_p10, %p55_p3  ;;  %p455_p13 = scmp.lt.s32.totalorder %s665_s14, 2 }
  0x13   : > { %s133_s25 = sand.u32 1, %s653_s11   ;;  %s437_s27 = sshll.u32 %s661_s13, 5 }
  0x14   : > { %s421_s26 = sshll.u32 %s133_s25, 5  ;;  %s143_s30 = scalar_lea.hbm %s826_s0, %s437_s27 }
  0x15   : > { %s137_s3 = scalar_lea.vmem [#allocation3], %s421_s26  ;;  %s144_s5 = sshll.u32 %s143_s30, 4  ;;  %s145_s5 = int_to_ptr.hbm [resolvable:$true] %s144_s5 }
  0x16   : > { %s146_s4 = sshll.u32 %s137_s3, 4  ;;  %p755_p0 = pnand %p455_p13, %p725_p4  ;;  %s147_s4 = int_to_ptr.vmem [resolvable:$true] %s146_s4 }
  0x17   : > { %p426_p1 = scmp.ge.s32.totalorder %s665_s14, 1  ;;  %s134_s7 = scalar_lea.sflag [#allocation4], %s133_s25 }
  0x18   : > { %s667_s8 = smov 128   ;;  %s668_s15 = smov 8  }
  0x19   : > { %447 = dma.hbm_to_vmem [thread:$0]  (!%p755_p0), %s145_s5, 512, %s147_s4, %s134_s7, %s667_s8, %s667_s8, %s668_s15  }
  0x1a   : > { %p174_p2 = scmp.lt.s32.totalorder %s665_s14, 3  ;;  %s424_s16 = sshll.u32 %s133_s25, 3 }
  0x1b   : > { %s425_s18 = sshll.u32 %s661_s13, 3  ;;  %s160_s27 = scalar_lea.vmem [#allocation6], %s424_s16 }
  0x1c   : > { %p175_p3 = pnand %p426_p1, %p174_p2  ;;  %s165_s19 = scalar_lea.hbm %s827_s1, %s425_s18 }
  0x1d   : > { %s169_s28 = sshll.u32 %s160_s27, 4  ;;  %s167_s29 = sshll.u32 %s165_s19, 4  ;;  %s170_s28 = int_to_ptr.vmem [resolvable:$true] %s169_s28  ;;  %s168_s29 = int_to_ptr.hbm [resolvable:$true] %s167_s29 }
  0x1e   : > { %s157_s30 = scalar_lea.sflag [#allocation7], %s133_s25  ;;  %178 = sbr.rel (%p175_p3) target bundleno = 96 (0x60), region = 28 }
  0x1f   : > { %450 = dma.hbm_to_vmem [thread:$0]  (!%p755_p0), %s168_s29, 128, %s170_s28, %s157_s30  }
  0x20   : > { %s770_s3 = sand.u32 (!%p175_p3), 1, %s649_s10  }
  0x21   : > { %s427_s4 = sshll.u32 (!%p175_p3), %s770_s3, 5  ;;  %s181_s5 = scalar_lea.sflag (!%p175_p3), [#allocation4], %s770_s3 }
  0x22   : > { %s184_s7 = scalar_lea.vmem (!%p175_p3), [#allocation3], %s427_s4 }
  0x23   : > { %632 = dma.done.wait (%p731_p8), %s181_s5, 512  }
  0x24   : > { %634 = vsyncadd (%p731_p8), %s181_s5, 4294966784  ;;  %s428_s25 = sshll.u32 %s770_s3, 3  ;;  %s191_s6 = scalar_lea.sflag [#allocation7], %s770_s3 }
  0x25   : > { %s194_s8 = scalar_lea.vmem [#allocation6], %s428_s25 }
  0x26   : > { %636 = dma.done.wait (%p731_p8), %s191_s6, 128  }
  0x27   : > { %638 = vsyncadd (%p731_p8), %s191_s6, 4294967168  ;;  %v234_v0 = vld [vmem:[%s184_s7] sm:$0xff]  ;;  %v430_v1 = vld [vmem:[%s184_s7 + $0x8] sm:$0xff]  ;;  %v226_v29 = vlaneseq  ;;  %s434_s21 = sshll.u32 %s657_s12, 3  ;;  %s220_s20 = scalar_lea.vmem [#allocation8], %s428_s25 }
  0x28   : > { %v431_v2 = vld [vmem:[%s184_s7 + $0x10] sm:$0xff]  ;;  %v244_v3 = vmax.f32 %v234_v0, %v430_v1  ;;  %v432_v4 = vld [vmem:[%s184_s7 + $0x18] sm:$0xff]  ;;  %v233_v15 = vld [vmem:[%s194_s8] sm:$0xff]  ;;  %s305_s18 = scalar_lea.hbm %s828_s2, %s434_s21  ;;  %s307_s26 = sshll.u32 %s220_s20, 4  ;;  %s308_s26 = int_to_ptr.vmem [resolvable:$true] %s307_s26 }
  0x29   : > { %vm251_vm0 = vcmp.eq.s32.totalorder %v233_v15, 0  ;;  %vm257_vm1 = vcmp.eq.s32.totalorder %v233_v15, 1  ;;  %vm263_vm2 = vcmp.eq.s32.totalorder %v233_v15, 2  ;;  %vm269_vm3 = vcmp.eq.s32.totalorder %v233_v15, 3  ;;  %s309_s19 = sshll.u32 %s305_s18, 4  ;;  %s295_s12 = scalar_lea.sflag [#allocation5], %s770_s3  ;;  %s310_s19 = int_to_ptr.hbm [resolvable:$true] %s309_s19 }
  0x2a   : > { %v245_v5 = vmax.f32 %v244_v3, %v431_v2  ;;  %v227_v32 = vshrl.u32 %v226_v29, 7  ;;  %v230_v34 = vand.u32 127, %v226_v29  ;;  %s593_s27 = sshra.s32 %s310_s19, 4  ;;  %s599_s4 = scalar_lea.hbm %s828_s2, 16  ;;  %s594_s27 = int_to_ptr.hbm [resolvable:$true] %s593_s27 }
  0x2b   : > { %s595_s28 = scalar_lea.hbm %s594_s27, 8  ;;  %p600_p7 = scmp.lt.s32.totalorder %s594_s27, %s828_s2 }
  0x2c   : > { %v246_v6 = vmax.f32 %v245_v5, %v432_v4  ;;  %v228_v33 = vmul.u32 128, %v227_v32  ;;  %p596_p4 = scmp.ne.s32.totalorder %s594_s27, %s595_s28  ;;  %p601_p8 = scmp.lt.s32.totalorder %s599_s4, %s595_s28 }
  0x2e   : > { %v247_v7 = vsub.f32 %v234_v0, %v246_v6  ;;  %v253_v8 = vsub.f32 %v430_v1, %v246_v6  ;;  %v259_v9 = vsub.f32 %v431_v2, %v246_v6  ;;  %v265_v10 = vsub.f32 %v432_v4, %v246_v6  ;;  %p597_p5 = pnand %p596_p4, %p735_p9  ;;  %p602_p10 = por %p601_p8, %p600_p7 }
  0x2f   : > { %v231_v37 = vadd.s32 %v230_v34, %v228_v33 }
  0x30   : > { %v248_v11 = vmul.f32 1.442695, %v247_v7  ;;  %v254_v12 = vmul.f32 1.442695, %v253_v8  ;;  %v260_v13 = vmul.f32 1.442695, %v259_v9  ;;  %p598_p6 = pneg %p597_p5 }
  0x31   : > { %v266_v14 = vmul.f32 1.442695, %v265_v10  ;;  %v252_v22 = vsel %vm251_vm0, %v247_v7, 0.0  ;;  %vm284_vm4 = vcmp.lt.s32.totalorder %v231_v37, 256 }
  0x32   : > { %507 = vpow2.f32 %v248_v11  ;;  %v258_v24 = vsel %vm257_vm1, %v253_v8, %v252_v22  ;;  %p603_p13 = pnand %p602_p10, %p598_p6 }
  0x33   : > { %509 = vpow2.f32 %v254_v12  ;;  %v264_v25 = vsel %vm263_vm2, %v259_v9, %v258_v24 }
  0x34   : > { %511 = vpow2.f32 %v260_v13  ;;  %v270_v27 = vsel %vm269_vm3, %v265_v10, %v264_v25 }
  0x35   : > { %513 = vpow2.f32 %v266_v14 }
  0x38   : > { %v508_v16 = vpop.eup %507 }
  0x39   : > { %v510_v17 = vpop.eup %509 }
  0x3a   : > { %v512_v18 = vpop.eup %511  ;;  %v256_v19 = vadd.f32 %v510_v17, %v508_v16 }
  0x3b   : > { %v514_v20 = vpop.eup %513 }
  0x3c   : > { %v262_v21 = vadd.f32 %v512_v18, %v256_v19 }
  0x3e   : > { %v268_v23 = vadd.f32 %v514_v20, %v262_v21 }
  0x40   : > { %515 = vlog2.f32 %v268_v23 }
  0x46   : > { %v516_v26 = vpop.eup %515 }
  0x47   : > { %v272_v28 = vmul.f32 0.6931472, %v516_v26 }
  0x49   : > { %v273_v30 = vsub.f32 %v270_v27, %v272_v28 }
  0x4b   : > { %v274_v31 = vmul.f32 1.442695, %v273_v30 }
  0x4d   : > { %517 = vpow2.f32 %v274_v31 }
  0x53   : > { %v518_v35 = vpop.eup %517 }
  0x54   : > { %v276_v36 = vsub.f32 1.0, %v518_v35 }
  0x56   : > { %v277_v38 = vmul.f32 %v276_v36, %v276_v36 }
  0x58   : > { %v278_v39 = vsub.f32 0.0, %v277_v38 }
  0x5a   : > { %v279_v40 = vmul.f32 %v278_v39, %v273_v30 }
  0x5c   : > { %v286_v41 = vsel %vm284_vm4, %v279_v40, 0.0 }
  0x5d   : > { %293 = vst [vmem:[%s220_s20] sm:$0xff] %v286_v41 }
  0x5e   : > { %606 = shalt.err (!%p603_p13)
}
  0x5f   : > { %442 = dma.vmem_to_hbm [thread:$0]  (%p735_p9), %s308_s26, 128, %s310_s19, %s295_s12  }
  0x60 PF: > { %s321_s3 = sand.u32 1, %s645_s9   ;;  %p452_p0 = pnand %p420_p12, %p742_p11 }
  0x61   : > { %s322_s25 = scalar_lea.sflag [#allocation5], %s321_s3 }
  0x62   : > { %p453_p1 = pneg %p452_p0 }
  0x64   : > { %640 = dma.done.wait (%p453_p1), %s322_s25, 128  }
  0x65   : > { %642 = vsyncadd (%p453_p1), %s322_s25, 4294967168  ;;  %s21_s14 = sadd.s32 1, %s665_s14   ;;  %s834_s9 = smov %s649_s10 }
  0x66   : > { %p18_p2 = scmp.ge.s32.totalorder %s21_s14, 4   ;;  %s835_s10 = smov %s653_s11 }
  0x67   : > { %s836_s11 = smov %s740_s23  ;;  %s837_s12 = smov %s661_s13 }
  0x68   : > { %s838_s13 = smov %s840_s17  ;;  %20 = sbr.rel (!%p18_p2) target bundleno = 8 (0x8), region = 97 }
  0x6d   :  { %328 = vsyncpa [#allocation4], 1 }
  0x6e   :  { %330 = vsyncpa [#allocation4 + $0x1], 1 }
  0x6f   :  { %331 = vsyncpa [#allocation7], 1 }
  0x70   :  { %333 = vsyncpa [#allocation7 + $0x1], 1 }
  0x71   :  { %334 = vsyncpa [#allocation5], 1 }
  0x72   :  { %336 = vsyncpa [#allocation5 + $0x1], 1 }

</bundles_post_ra>
